<compile_context>
chip_gen: v7x
topology: tpu7x:2x2x1
jax: 0.10.0
libtpu: 0.0.40
codegen_flags: <defaults>
</compile_context>

<pallas_src>
import jax
import jax.numpy as jnp
from jax.experimental import pallas as pl
from jax.experimental.pallas import tpu as pltpu

_LANE = 128  # vreg lane width


def _leaky_relu_kernel(x_ref, o_ref):
    x = x_ref[...]
    o_ref[...] = jnp.maximum(x * jnp.asarray(0.1, x.dtype), x)


def _round_up(a, b):
    return ((a + b - 1) // b) * b


def leaky_relu_pallas(x, *, tile_rows=4096):
    """Elementwise max(0.1*x, x) on an arbitrarily-shaped array.

    tile_rows=4096 -> 2 MiB f32 blocks (8 MiB live VMEM with double-buffered
    in+out): ~HBM-roofline on v5e/v6e/v7x.  Bump to 8192 on v7x for ~4 MiB
    blocks if profiling shows exposed per-step overhead.
    """
    orig_shape = x.shape
    orig_dtype = x.dtype
    n = x.size
    if n == 0:
        return x

    # Flatten; pad only up to the 128-lane width (NOT tile_rows*128) so the
    # common case (n % 128 == 0) does no extra host-side copy at all.
    x_flat = jnp.reshape(x, (-1,))
    pad = (-n) % _LANE
    if pad:
        x_flat = jnp.pad(x_flat, (0, pad))
    rows = (n + pad) // _LANE
    x2d = jnp.reshape(x_flat, (rows, _LANE))

    # Clamp the block to the actual problem size (kept a multiple of 8
    # sublanes); the last, possibly partial, block is masked by Pallas.
    tile_rows = max(8, min(tile_rows, _round_up(rows, 8)))
    grid = (pl.cdiv(rows, tile_rows),)

    out2d = pl.pallas_call(
        _leaky_relu_kernel,
        out_shape=jax.ShapeDtypeStruct((rows, _LANE), orig_dtype),
        grid_spec=pltpu.PrefetchScalarGridSpec(
            num_scalar_prefetch=0,
            grid=grid,
            in_specs=[pl.BlockSpec((tile_rows, _LANE), lambda i: (i, 0))],
            out_specs=pl.BlockSpec((tile_rows, _LANE), lambda i: (i, 0)),
        ),
        compiler_params=pltpu.CompilerParams(
            dimension_semantics=("parallel",),   # shards grid over v7x's 2 TCs
            vmem_limit_bytes=32 * 1024 * 1024,   # headroom for larger tiles; safe on all chips
        ),
        # Shape/dtype-preserving elementwise op: let XLA reuse the input buffer.
        input_output_aliases={0: 0},
    )(x2d)

    if pad:
        out_flat = jnp.reshape(out2d, (-1,))[:n]
        return jnp.reshape(out_flat, orig_shape)
    return jnp.reshape(out2d, orig_shape)


if __name__ == "__main__":
    key = jax.random.PRNGKey(0)
    # Small NCHW input consistent with the module's usage.
    x = jax.random.normal(key, (2, 4, 16, 16), dtype=jnp.float32)

    # Reference computed before the kernel call (input may be aliased).
    ref = jnp.maximum(0.1 * x, x)

    out = leaky_relu_pallas(x)
    out = jax.block_until_ready(out)

    assert out.shape == x.shape and out.dtype == x.dtype
    assert jnp.allclose(out, ref, atol=1e-6, rtol=1e-6)

    print("KERNEL_OK")
</pallas_src>

<mosaic_0001>
module attributes {stable_mosaic.version = 11 : i64} {
  func.func @_leaky_relu_kernel(%arg0: i32, %arg1: memref<16x128xf32, #tpu.memory_space<vmem>>, %arg2: memref<16x128xf32, #tpu.memory_space<vmem>>) attributes {dimension_semantics = [#tpu.dimension_semantics<parallel>], iteration_bounds = array<i64: 1>, scalar_prefetch = 0 : i64, scratch_operands = 0 : i64, tpu.core_type = #tpu.core_type<tc>, window_params = [{transform_indices = @transform_0, window_bounds = array<i64: 16, 128>}, {transform_indices = @transform_1, window_bounds = array<i64: 16, 128>}]} {
    %c0 = arith.constant 0 : index
    %c0_0 = arith.constant 0 : index
    %0 = vector.load %arg1[%c0, %c0_0] : memref<16x128xf32, #tpu.memory_space<vmem>>, vector<16x128xf32>
    %cst = arith.constant 1.000000e-01 : f32
    %1 = vector.broadcast %cst : f32 to vector<16x128xf32>
    %2 = arith.mulf %0, %1 : vector<16x128xf32>
    %3 = arith.maximumf %2, %0 : vector<16x128xf32>
    %c0_1 = arith.constant 0 : index
    %c0_2 = arith.constant 0 : index
    %4 = vector.load %arg2[%c0_1, %c0_2] : memref<16x128xf32, #tpu.memory_space<vmem>>, vector<16x128xf32>
    tpu.vector_store %arg2[%c0_1, %c0_2], %3 {strides = array<i32>} : memref<16x128xf32, #tpu.memory_space<vmem>>, vector<16x128xf32>,
    return
  }
  func.func @transform_0(%arg0: i32) -> (i32, i32) {
    %c0_i32 = arith.constant 0 : i32
    %c0_i32_0 = arith.constant 0 : i32
    return %arg0, %c0_i32 : i32, i32
  }
  func.func @transform_1(%arg0: i32) -> (i32, i32) {
    %c0_i32 = arith.constant 0 : i32
    %c0_i32_0 = arith.constant 0 : i32
    return %arg0, %c0_i32 : i32, i32
  }
}

</mosaic_0001>

<bundles_post_ra>
// kernel: tpu_custom_call.1
= control target key start
LH: loop header
LB: loop body
LE: loop exit
PB: predicated region body
PF: predicated region fallthrough
CT: control target
= control target key end

     0   :  { %6 = vsyncpa [#allocation3], 0  ;;  %s144_s0 = inlined_call_operand.hbm [shape: f32[16,128], index: 0, kind: input, shape index: {}, may-alias: {0,1}]   ;;  %s145_s1 = inlined_call_operand.hbm [shape: f32[16,128], index: 1, kind: output, shape index: {}, may-alias: {0,1}]  }
   0x1   :  { %7 = vsyncpa [#allocation4], 0  ;;  %s100_s6 = smov [#allocation2]   ;;  %s52_s10 = scalar_lea.hbm %s144_s0, 256 }
   0x2   :  { %s13_s7 = sshll.u32 %s100_s6, 4  ;;  %p53_p0 = scmp.ne.s32.totalorder %s144_s0, %s52_s10  ;;  %s14_s7 = int_to_ptr.vmem [resolvable:$true] %s13_s7 }
   0x3   :  { %p56_p1 = scmp.lt.u32.totalorder %s52_s10, %s144_s0 }
   0x5   :  { %p58_p2 = pnand %p56_p1, %p53_p0 }
   0x7   :  { %61 = shalt.err (!%p58_p2)
}
   0x8   :  { %s62_s15 = scalar_lea.vmem %s14_s7, 256  ;;  %p67_p4 = scmp.lt.s32.totalorder %s14_s7, %s14_s7 }
   0x9   :  { %p63_p3 = scmp.ne.s32.totalorder %s14_s7, %s62_s15  ;;  %p68_p5 = scmp.lt.s32.totalorder %s62_s15, %s62_s15 }
   0xb   :  { %p69_p6 = por %p68_p5, %p67_p4 }
   0xd   :  { %p70_p7 = pnand %p69_p6, %p63_p3 }
   0xf   :  { %73 = shalt.err (!%p70_p7)
}
  0x10   :  { %s101_s16 = smov 128   ;;  %s102_s17 = smov 8  }
  0x11   :  { %19 = dma.hbm_to_vmem [thread:$0]  %s144_s0, 256, %s14_s7, [#allocation3], %s101_s16, %s101_s16, %s102_s17  }
  0x12   :  { %96 = dma.done.wait [#allocation3], 256  }
  0x13   :  { %97 = vsyncadd [#allocation3], 4294967040  ;;  %v23_v0 = vld [vmem:[#allocation2] sm:$0xff]  ;;  %v24_v1 = vld [vmem:[#allocation2 + $0x8] sm:$0xff]  ;;  %s103_s20 = smov [#allocation5]  }
  0x14   :  { %s36_s21 = sshll.u32 %s103_s20, 4  ;;  %v25_v2 = vmul.f32 0.1, %v23_v0  ;;  %v26_v3 = vmul.f32 0.1, %v24_v1  ;;  %s37_s21 = int_to_ptr.vmem [resolvable:$true] %s36_s21 }
  0x15   :  { %s74_s22 = scalar_lea.vmem %s37_s21, 256  ;;  %p79_p9 = scmp.lt.s32.totalorder %s37_s21, %s37_s21 }
  0x16   :  { %v27_v4 = vmax.f32 %v25_v2, %v23_v0  ;;  %v28_v5 = vmax.f32 %v26_v3, %v24_v1  ;;  %p75_p8 = scmp.ne.s32.totalorder %s37_s21, %s74_s22  ;;  %p80_p10 = scmp.lt.s32.totalorder %s74_s22, %s74_s22 }
  0x18   :  { %29 = vst [vmem:[#allocation5] sm:$0xff] %v27_v4  ;;  %30 = vst [vmem:[#allocation5 + $0x8] sm:$0xff] %v28_v5  ;;  %p81_p11 = por %p80_p10, %p79_p9 }
  0x1a   :  { %p82_p12 = pnand %p81_p11, %p75_p8 }
  0x1c   :  { %85 = shalt.err (!%p82_p12)
}
  0x1d   :  { %s86_s24 = scalar_lea.hbm %s145_s1, 256 }
  0x1e   :  { %p87_p13 = scmp.ne.s32.totalorder %s145_s1, %s86_s24  ;;  %p90_p0 = scmp.lt.u32.totalorder %s86_s24, %s145_s1 }
  0x20   :  { %p92_p1 = pnand %p90_p0, %p87_p13 }
  0x22   :  { %95 = shalt.err (!%p92_p1)
}
  0x23   :  { %42 = dma.vmem_to_hbm [thread:$0]  %s37_s21, 256, %s145_s1, [#allocation4], %s101_s16, %s101_s16, %s102_s17  }
  0x24   :  { %98 = dma.done.wait [#allocation4], 256  }
  0x25   :  { %99 = vsyncadd [#allocation4], 4294967040 }
  0x26   :  { %46 = vsyncpa [#allocation3], 1 }
  0x27   :  { %47 = vsyncpa [#allocation4], 1 }

</bundles_post_ra>
